<compile_context>
chip_gen: v6e
topology: v6e:2x2x1
jax: 0.10.0
libtpu: 0.0.40
codegen_flags: <defaults>
</compile_context>

<pallas_src>
import functools

import jax
import jax.numpy as jnp
from jax import lax
from jax.experimental import pallas as pl
from jax.experimental.pallas import tpu as pltpu


def _critic_kernel(s_ref, a_ref, w1_ref, b1_ref, w2h_ref, w2a_ref, b2_ref,
                   w3c_ref, b3_ref, o_ref):
    """One batch tile.  Inputs arrive batch-major (tb, feat); activations are
    computed feature-major (features, tb) so batch rides the 128-lane axis."""
    # Contract feature axes directly: (H, K) x (tb, K) -> (H, tb).  The MXU
    # handles the operand transpose; the wrapper never materializes s.T / a.T.
    dn = (((1,), (1,)), ((), ()))

    # fc1: h1 = relu(W1 @ s^T + b1)                      (H1, tb)
    h1 = lax.dot_general(w1_ref[...], s_ref[...], dn,
                         preferred_element_type=jnp.float32)
    h1 = jnp.maximum(h1 + b1_ref[...], 0.0)

    # fc2 on concat([h1, a]):  W2_h @ h1 + W2_a @ a^T    (H2, tb)
    h2 = jnp.dot(w2h_ref[...], h1, preferred_element_type=jnp.float32)
    h2 = h2 + lax.dot_general(w2a_ref[...], a_ref[...], dn,
                              preferred_element_type=jnp.float32)
    h2 = jnp.maximum(h2 + b2_ref[...], 0.0)

    # fc3 (M=1): skip the MXU weight push/drain — VPU broadcast-multiply by the
    # W3 column, then XLU sublane reduction over H2.      (1, tb) lane-dense
    q = jnp.sum(w3c_ref[...].astype(jnp.float32) * h2, axis=0, keepdims=True)
    o_ref[...] = q + b3_ref[...]


def _round_up(x, m):
    return (x + m - 1) // m * m


@functools.partial(jax.jit, static_argnames=("tile_b", "stream_dtype"))
def critic_forward(state, action, params, *, tile_b=2048,
                   stream_dtype=jnp.float32):
    """state: (B, input_size), action: (B, action_size) -> (B, 1) float32."""
    w1, b1 = params["w1"], params["b1"]
    w2_h, w2_a, b2 = params["w2_h"], params["w2_a"], params["b2"]
    w3, b3 = params["w3"], params["b3"]

    B, in_size = state.shape
    act_size = action.shape[1]
    h1_size = w1.shape[0]
    h2_size = w2_h.shape[0]

    # Optional low-precision streaming of the matmul operands (bf16 MXU on
    # v6e/v7x); accumulation / bias adds / ReLU stay in f32, output stays f32.
    if jnp.dtype(stream_dtype) != jnp.dtype(jnp.float32):
        state = state.astype(stream_dtype)
        action = action.astype(stream_dtype)
        w1 = w1.astype(stream_dtype)
        w2_h = w2_h.astype(stream_dtype)
        w2_a = w2_a.astype(stream_dtype)
        w3 = w3.astype(stream_dtype)

    # Batch tile size:
    #   * always a multiple of 128 when tiling (lane axis of the (1, tb)
    #     output, sublane axis of the ragged input blocks),
    #   * one untiled block for small batches (no per-step overhead),
    #   * >=2 tiles when B >= 256 so dimension_semantics=("parallel",) can put
    #     work on both v7x TensorCores.
    tile_b = max(128, _round_up(int(tile_b), 128))
    if B > tile_b:
        tb = tile_b
    elif B >= 256:
        tb = _round_up(-(-B // 2), 128)
    else:
        tb = B
    # Ragged last block: Pallas masks the out-of-bounds output writes and the
    # garbage batch lanes never mix across lanes (reductions are over features).
    grid = (pl.cdiv(B, tb),)

    def batch_spec(feat):
        return pl.BlockSpec((tb, feat), lambda i: (i, 0))

    def resident_spec(shape):
        return pl.BlockSpec(shape, lambda i: (0, 0))

    out_t = pl.pallas_call(
        _critic_kernel,
        out_shape=jax.ShapeDtypeStruct((1, B), jnp.float32),
        grid=grid,
        in_specs=[
            batch_spec(in_size),                 # state   (B, in)  batch-major
            batch_spec(act_size),                # action  (B, act) batch-major
            resident_spec((h1_size, in_size)),   # W1
            resident_spec((h1_size, 1)),         # b1
            resident_spec((h2_size, h1_size)),   # W2 (h1 columns)
            resident_spec((h2_size, act_size)),  # W2 (action columns)
            resident_spec((h2_size, 1)),         # b2
            resident_spec((h2_size, 1)),         # W3 column
            resident_spec((1, 1)),               # b3
        ],
        out_specs=pl.BlockSpec((1, tb), lambda i: (0, i)),
        compiler_params=pltpu.CompilerParams(
            dimension_semantics=("parallel",)),
    )(state, action, w1, b1[:, None], w2_h, w2_a, b2[:, None],
      w3.reshape(h2_size, 1), b3.reshape(1, 1))

    return out_t.reshape(B, 1)


def init_critic_params(key, input_size, action_size, hidd1_size, hidd2_size,
                       weight_init=0.003):
    """Synthetic init mirroring the PyTorch module.

    Weights are stored in PyTorch nn.Linear layout (out_features, in_features).
    fc1/fc2 use default nn.Linear init (uniform +-1/sqrt(fan_in)); fc3 uses
    uniform +-weight_init.  fc2's weight is pre-split into its h1 and action
    column blocks so the concat is handled once at init time.
    """
    k1, k2, k3, k4, k5, k6 = jax.random.split(key, 6)
    bnd1 = 1.0 / jnp.sqrt(input_size)
    bnd2 = 1.0 / jnp.sqrt(hidd1_size + action_size)
    w2 = jax.random.uniform(k3, (hidd2_size, hidd1_size + action_size),
                            jnp.float32, -bnd2, bnd2)
    return {
        "w1": jax.random.uniform(k1, (hidd1_size, input_size), jnp.float32,
                                 -bnd1, bnd1),
        "b1": jax.random.uniform(k2, (hidd1_size,), jnp.float32, -bnd1, bnd1),
        "w2_h": w2[:, :hidd1_size],
        "w2_a": w2[:, hidd1_size:],
        "b2": jax.random.uniform(k4, (hidd2_size,), jnp.float32, -bnd2, bnd2),
        "w3": jax.random.uniform(k5, (1, hidd2_size), jnp.float32,
                                 -weight_init, weight_init),
        "b3": jax.random.uniform(k6, (1,), jnp.float32,
                                 -weight_init, weight_init),
    }


def _reference_forward(state, action, params):
    h1 = jax.nn.relu(state @ params["w1"].T + params["b1"])
    x = jnp.concatenate([h1, action], axis=1)
    w2 = jnp.concatenate([params["w2_h"], params["w2_a"]], axis=1)
    h2 = jax.nn.relu(x @ w2.T + params["b2"])
    return h2 @ params["w3"].T + params["b3"]


if __name__ == "__main__":
    input_size = 16
    action_size = 4
    hidd1_size = 32
    hidd2_size = 32

    key = jax.random.PRNGKey(0)
    kp, ks, ka, ks2, ka2 = jax.random.split(key, 5)
    params = init_critic_params(kp, input_size, action_size,
                                hidd1_size, hidd2_size)

    # 1) Small batch: single untiled block, no masking beyond the (1, B) store.
    batch = 8
    state = jax.random.normal(ks, (batch, input_size), jnp.float32)
    action = jax.random.normal(ka, (batch, action_size), jnp.float32)
    out = critic_forward(state, action, params)
    jax.block_until_ready(out)
    ref = _reference_forward(state, action, params)
    assert out.shape == (batch, 1)
    assert jnp.allclose(out, ref, atol=1e-5, rtol=1e-5)

    # 2) Medium batch: two lane-dense tiles (512 + ragged 488), no pad pass,
    #    both v7x TensorCores engaged via the parallel grid axis.
    big_batch = 1000
    state_b = jax.random.normal(ks2, (big_batch, input_size), jnp.float32)
    action_b = jax.random.normal(ka2, (big_batch, action_size), jnp.float32)
    out_b = critic_forward(state_b, action_b, params)
    jax.block_until_ready(out_b)
    ref_b = _reference_forward(state_b, action_b, params)
    assert out_b.shape == (big_batch, 1)
    assert jnp.allclose(out_b, ref_b, atol=1e-5, rtol=1e-5)

    # 3) Streaming path (B > tile_b): 4 tiles of 256, ragged last block of 232.
    out_s = critic_forward(state_b, action_b, params, tile_b=256)
    jax.block_until_ready(out_s)
    assert jnp.allclose(out_s, ref_b, atol=1e-5, rtol=1e-5)

    # 4) bf16 streaming (v6e/v7x bandwidth path): f32 accumulation, looser parity.
    out_bf = critic_forward(state_b, action_b, params,
                            stream_dtype=jnp.bfloat16)
    jax.block_until_ready(out_bf)
    assert jnp.allclose(out_bf, ref_b, atol=2e-2, rtol=2e-2)

    print("KERNEL_OK")
</pallas_src>

<mosaic_0001>
module attributes {stable_mosaic.version = 11 : i64} {
  func.func @_critic_kernel(%arg0: i32, %arg1: memref<8x16xf32, #tpu.memory_space<vmem>>, %arg2: memref<8x4xf32, #tpu.memory_space<vmem>>, %arg3: memref<32x16xf32, #tpu.memory_space<vmem>>, %arg4: memref<32x1xf32, #tpu.memory_space<vmem>>, %arg5: memref<32x32xf32, #tpu.memory_space<vmem>>, %arg6: memref<32x4xf32, #tpu.memory_space<vmem>>, %arg7: memref<32x1xf32, #tpu.memory_space<vmem>>, %arg8: memref<32x1xf32, #tpu.memory_space<vmem>>, %arg9: memref<1x1xf32, #tpu.memory_space<vmem>>, %arg10: memref<1x8xf32, #tpu.memory_space<vmem>>) attributes {dimension_semantics = [#tpu.dimension_semantics<parallel>], iteration_bounds = array<i64: 1>, scalar_prefetch = 0 : i64, scratch_operands = 0 : i64, tpu.core_type = #tpu.core_type<tc>, window_params = [{transform_indices = @transform_0, window_bounds = array<i64: 8, 16>}, {transform_indices = @transform_1, window_bounds = array<i64: 8, 4>}, {pipeline_mode = #tpu.pipeline_mode<synchronous>, transform_indices = @transform_2, window_bounds = array<i64: 32, 16>}, {pipeline_mode = #tpu.pipeline_mode<synchronous>, transform_indices = @transform_3, window_bounds = array<i64: 32, 1>}, {pipeline_mode = #tpu.pipeline_mode<synchronous>, transform_indices = @transform_4, window_bounds = array<i64: 32, 32>}, {pipeline_mode = #tpu.pipeline_mode<synchronous>, transform_indices = @transform_5, window_bounds = array<i64: 32, 4>}, {pipeline_mode = #tpu.pipeline_mode<synchronous>, transform_indices = @transform_6, window_bounds = array<i64: 32, 1>}, {pipeline_mode = #tpu.pipeline_mode<synchronous>, transform_indices = @transform_7, window_bounds = array<i64: 32, 1>}, {pipeline_mode = #tpu.pipeline_mode<synchronous>, transform_indices = @transform_8, window_bounds = array<i64: 1, 1>}, {transform_indices = @transform_9, window_bounds = array<i64: 1, 8>}]} {
    %c0 = arith.constant 0 : index
    %c0_0 = arith.constant 0 : index
    %0 = vector.load %arg3[%c0, %c0_0] : memref<32x16xf32, #tpu.memory_space<vmem>>, vector<32x16xf32>
    %c0_1 = arith.constant 0 : index
    %c0_2 = arith.constant 0 : index
    %1 = vector.load %arg1[%c0_1, %c0_2] : memref<8x16xf32, #tpu.memory_space<vmem>>, vector<8x16xf32>
    %cst = arith.constant dense<0.000000e+00> : vector<32x8xf32>
    %2 = tpu.matmul %0, %1, %cst {dimension_numbers = #tpu.dot_dimension_numbers<[1], [1], [0], [0], [0, 0, 1, 0], [], []>} : vector<32x16xf32>, vector<8x16xf32>, vector<32x8xf32> -> vector<32x8xf32>
    %c0_3 = arith.constant 0 : index
    %c0_4 = arith.constant 0 : index
    %3 = vector.load %arg4[%c0_3, %c0_4] : memref<32x1xf32, #tpu.memory_space<vmem>>, vector<32x1xf32>
    %4 = vector.broadcast %3 : vector<32x1xf32> to vector<32x8xf32>
    %5 = arith.addf %2, %4 : vector<32x8xf32>
    %cst_5 = arith.constant 0.000000e+00 : f32
    %6 = vector.broadcast %cst_5 : f32 to vector<32x8xf32>
    %7 = arith.maximumf %5, %6 : vector<32x8xf32>
    %c0_6 = arith.constant 0 : index
    %c0_7 = arith.constant 0 : index
    %8 = vector.load %arg5[%c0_6, %c0_7] : memref<32x32xf32, #tpu.memory_space<vmem>>, vector<32x32xf32>
    %cst_8 = arith.constant dense<0.000000e+00> : vector<32x8xf32>
    %9 = tpu.matmul %8, %7, %cst_8 {dimension_numbers = #tpu.dot_dimension_numbers<[1], [0], [0], [1], [0, 0, 1, 1], [], []>} : vector<32x32xf32>, vector<32x8xf32>, vector<32x8xf32> -> vector<32x8xf32>
    %c0_9 = arith.constant 0 : index
    %c0_10 = arith.constant 0 : index
    %10 = vector.load %arg6[%c0_9, %c0_10] : memref<32x4xf32, #tpu.memory_space<vmem>>, vector<32x4xf32>
    %c0_11 = arith.constant 0 : index
    %c0_12 = arith.constant 0 : index
    %11 = vector.load %arg2[%c0_11, %c0_12] : memref<8x4xf32, #tpu.memory_space<vmem>>, vector<8x4xf32>
    %cst_13 = arith.constant dense<0.000000e+00> : vector<32x8xf32>
    %12 = tpu.matmul %10, %11, %cst_13 {dimension_numbers = #tpu.dot_dimension_numbers<[1], [1], [0], [0], [0, 0, 1, 0], [], []>} : vector<32x4xf32>, vector<8x4xf32>, vector<32x8xf32> -> vector<32x8xf32>
    %13 = arith.addf %9, %12 : vector<32x8xf32>
    %c0_14 = arith.constant 0 : index
    %c0_15 = arith.constant 0 : index
    %14 = vector.load %arg7[%c0_14, %c0_15] : memref<32x1xf32, #tpu.memory_space<vmem>>, vector<32x1xf32>
    %15 = vector.broadcast %14 : vector<32x1xf32> to vector<32x8xf32>
    %16 = arith.addf %13, %15 : vector<32x8xf32>
    %cst_16 = arith.constant 0.000000e+00 : f32
    %17 = vector.broadcast %cst_16 : f32 to vector<32x8xf32>
    %18 = arith.maximumf %16, %17 : vector<32x8xf32>
    %c0_17 = arith.constant 0 : index
    %c0_18 = arith.constant 0 : index
    %19 = vector.load %arg8[%c0_17, %c0_18] : memref<32x1xf32, #tpu.memory_space<vmem>>, vector<32x1xf32>
    %20 = vector.broadcast %19 : vector<32x1xf32> to vector<32x8xf32>
    %21 = arith.mulf %20, %18 : vector<32x8xf32>
    %cst_19 = arith.constant dense<0.000000e+00> : vector<8xf32>
    %22 = vector.multi_reduction <add>, %21, %cst_19 [0] : vector<32x8xf32> to vector<8xf32>
    %23 = vector.shape_cast %22 : vector<8xf32> to vector<1x8xf32>
    %c0_20 = arith.constant 0 : index
    %c0_21 = arith.constant 0 : index
    %24 = vector.load %arg9[%c0_20, %c0_21] : memref<1x1xf32, #tpu.memory_space<vmem>>, vector<1x1xf32>
    %25 = vector.broadcast %24 : vector<1x1xf32> to vector<1x8xf32>
    %26 = arith.addf %23, %25 : vector<1x8xf32>
    %c0_22 = arith.constant 0 : index
    %c0_23 = arith.constant 0 : index
    %27 = vector.load %arg10[%c0_22, %c0_23] : memref<1x8xf32, #tpu.memory_space<vmem>>, vector<1x8xf32>
    tpu.vector_store %arg10[%c0_22, %c0_23], %26 {strides = array<i32>} : memref<1x8xf32, #tpu.memory_space<vmem>>, vector<1x8xf32>,
    return
  }
  func.func @transform_0(%arg0: i32) -> (i32, i32) {
    %c0_i32 = arith.constant 0 : i32
    %c0_i32_0 = arith.constant 0 : i32
    return %arg0, %c0_i32 : i32, i32
  }
  func.func @transform_1(%arg0: i32) -> (i32, i32) {
    %c0_i32 = arith.constant 0 : i32
    %c0_i32_0 = arith.constant 0 : i32
    return %arg0, %c0_i32 : i32, i32
  }
  func.func @transform_2(%arg0: i32) -> (i32, i32) {
    %c0_i32 = arith.constant 0 : i32
    %c0_i32_0 = arith.constant 0 : i32
    %c0_i32_1 = arith.constant 0 : i32
    return %c0_i32, %c0_i32_0 : i32, i32
  }
  func.func @transform_3(%arg0: i32) -> (i32, i32) {
    %c0_i32 = arith.constant 0 : i32
    %c0_i32_0 = arith.constant 0 : i32
    %c0_i32_1 = arith.constant 0 : i32
    return %c0_i32, %c0_i32_0 : i32, i32
  }
  func.func @transform_4(%arg0: i32) -> (i32, i32) {
    %c0_i32 = arith.constant 0 : i32
    %c0_i32_0 = arith.constant 0 : i32
    %c0_i32_1 = arith.constant 0 : i32
    return %c0_i32, %c0_i32_0 : i32, i32
  }
  func.func @transform_5(%arg0: i32) -> (i32, i32) {
    %c0_i32 = arith.constant 0 : i32
    %c0_i32_0 = arith.constant 0 : i32
    %c0_i32_1 = arith.constant 0 : i32
    return %c0_i32, %c0_i32_0 : i32, i32
  }
  func.func @transform_6(%arg0: i32) -> (i32, i32) {
    %c0_i32 = arith.constant 0 : i32
    %c0_i32_0 = arith.constant 0 : i32
    %c0_i32_1 = arith.constant 0 : i32
    return %c0_i32, %c0_i32_0 : i32, i32
  }
  func.func @transform_7(%arg0: i32) -> (i32, i32) {
    %c0_i32 = arith.constant 0 : i32
    %c0_i32_0 = arith.constant 0 : i32
    %c0_i32_1 = arith.constant 0 : i32
    return %c0_i32, %c0_i32_0 : i32, i32
  }
  func.func @transform_8(%arg0: i32) -> (i32, i32) {
    %c0_i32 = arith.constant 0 : i32
    %c0_i32_0 = arith.constant 0 : i32
    %c0_i32_1 = arith.constant 0 : i32
    return %c0_i32, %c0_i32_0 : i32, i32
  }
  func.func @transform_9(%arg0: i32) -> (i32, i32) {
    %c0_i32 = arith.constant 0 : i32
    %c0_i32_0 = arith.constant 0 : i32
    return %c0_i32, %arg0 : i32, i32
  }
}

</mosaic_0001>

<bundles_post_ra>
// kernel: critic_forward.1
= control target key start
LH: loop header
LB: loop body
LE: loop exit
PB: predicated region body
PF: predicated region fallthrough
CT: control target
= control target key end

     0   :  { %s720_s0 = inlined_call_operand.vmem [shape: f32[8,16], index: 0, kind: input, shape index: {}]   ;;  %s721_s1 = inlined_call_operand.vmem [shape: f32[8,4], index: 1, kind: input, shape index: {}]   ;;  %s722_s2 = inlined_call_operand.vmem [shape: f32[32,16], index: 2, kind: input, shape index: {}]   ;;  %s723_s3 = inlined_call_operand.vmem [shape: f32[32,1], index: 3, kind: input, shape index: {}]   ;;  %s724_s4 = inlined_call_operand.vmem [shape: f32[32,32], index: 4, kind: input, shape index: {}]   ;;  %s725_s5 = inlined_call_operand.vmem [shape: f32[32,4], index: 5, kind: input, shape index: {}]   ;;  %s726_s6 = inlined_call_operand.vmem [shape: f32[32,1], index: 6, kind: input, shape index: {}]   ;;  %s727_s7 = inlined_call_operand.vmem [shape: f32[32,1], index: 7, kind: input, shape index: {}]   ;;  %s728_s8 = inlined_call_operand.<no memory space> [shape: f32[1,1], index: 8, kind: input, shape index: {}]   ;;  %s729_s9 = inlined_call_operand.hbm [shape: f32[1,8], index: 9, kind: output, shape index: {}]  }
   0x1   :  { %v14_v0 = vstv %s728_s8 }
   0x2   :  { %15 = vst [vmem:[#allocation2] sm:$0x1] %v14_v0 }
   0x3   :  { %v39_v1 = vld [vmem:[%s720_s0] sm:$0xff]  ;;  %vm64_vm0 = vcmask 130048   ;;  %v43_v3 = vld [vmem:[%s723_s3 + $0x18] sm:$0xff]  ;;  %v36_v4 = vld [vmem:[%s722_s2 + $0x8] sm:$0xff]  ;;  %v574_v5 = vmov 0  }
   0x4   :  { %v35_v2 = vld [vmem:[%s722_s2] sm:$0xff]  ;;  %510 = vmatprep.subr.msk.mxu0 %vm64_vm0, %v39_v1  ;;  %550 = vset.pattern.permute.xlu0 %v574_v5  ;;  %v41_v6 = vld [vmem:[%s723_s3 + $0x8] sm:$0xff]  ;;  %v37_v7 = vld [vmem:[%s722_s2 + $0x10] sm:$0xff] }
   0x5   :  { %512 = vmatprep.mubr.msk.f32.mxu0 %vm64_vm0, %v35_v2  ;;  %511 = vmatpush3.xpose.msk.msra.mxu0 %vm64_vm0, %v39_v1  ;;  %v42_v8 = vld [vmem:[%s723_s3 + $0x10] sm:$0xff]  ;;  %v40_v9 = vld [vmem:[%s723_s3] sm:$0xff]  ;;  %v38_v10 = vld [vmem:[%s722_s2 + $0x18] sm:$0xff] }
   0x6   :  { %61 = vperm.xlu0 %550, %v43_v3   ;;  %551 = vset.pattern.permute.xlu1 %v574_v5 }
   0x7   :  { %51 = vperm.xlu1 %551, %v41_v6  }
   0x8   :  { %513 = vmatmul.mubr.msk.f32.vlgmr.msra.gmra.mxu0 %vm64_vm0, %v36_v4 }
   0x9   :  { %515 = vmatprep.mubr.msk.f32.mxu0 %vm64_vm0, %v37_v7 }
   0xa   :  { %16 = vsyncpa [#allocation4], 0  ;;  %56 = vperm.xlu0 %550, %v42_v8   ;;  %v377_v11 = vld [vmem:[%s726_s6] sm:$0xff]  ;;  %v378_v12 = vld [vmem:[%s726_s6 + $0x8] sm:$0xff]  ;;  %vm178_vm1 = vcmask 31744   ;;  %vm279_vm2 = vcmask 261120  }
   0xb   :  { %46 = vperm.xlu1 %551, %v40_v9   ;;  %v379_v13 = vld [vmem:[%s726_s6 + $0x10] sm:$0xff]  ;;  %v380_v14 = vld [vmem:[%s726_s6 + $0x18] sm:$0xff]  ;;  %v409_v15 = vld [vmem:[%s727_s7] sm:$0xff]  ;;  %vm437_vm3 = vcmask 64512   ;;  %vm462_vm4 = vcmask 57344  }
   0xc   :  { %516 = vmatmul.mubr.msk.f32.gmra.mxu0 %vm64_vm0, %v38_v10  ;;  %v410_v16 = vld [vmem:[%s727_s7 + $0x8] sm:$0xff]  ;;  %v411_v17 = vld [vmem:[%s727_s7 + $0x10] sm:$0xff]  ;;  %v412_v18 = vld [vmem:[%s727_s7 + $0x18] sm:$0xff] }
   0xd   :  { %v451_v19 = vld [vmem:[#allocation2] sm:$0x1]  ;;  %v174_v22 = vld [vmem:[%s725_s5 + $0x8] sm:$0xff]  ;;  %v175_v23 = vld [vmem:[%s725_s5 + $0x10] sm:$0xff] }
   0xe   :  { %383 = vperm.xlu0 %550, %v377_v11   ;;  %v177_v20 = vld [vmem:[%s721_s1] sm:$0xff]  ;;  %v176_v24 = vld [vmem:[%s725_s5 + $0x18] sm:$0xff]  ;;  %v171_v26 = vld [vmem:[%s724_s4 + $0x10] sm:$0xff] }
   0xf   :  { %388 = vperm.xlu1 %551, %v378_v12   ;;  %518 = vmatprep.subr.msk.mxu1 %vm178_vm1, %v177_v20  ;;  %v173_v21 = vld [vmem:[%s725_s5] sm:$0xff]  ;;  %v170_v43 = vld [vmem:[%s724_s4 + $0x8] sm:$0xff]  ;;  %v172_v44 = vld [vmem:[%s724_s4 + $0x18] sm:$0xff] }
  0x10   :  { %519 = vmatpush3.xpose.msk.msra.mxu1 %vm178_vm1, %v177_v20  ;;  %520 = vmatprep.mubr.msk.f32.mxu1 %vm178_vm1, %v173_v21  ;;  %v169_v25 = vld [vmem:[%s724_s4] sm:$0xff]  ;;  %s575_s4 = smov [#allocation3]  }
  0x11   :  { %534 = vmatprep.mubr.msk.f32.mxu0 %vm279_vm2, %v169_v25  ;;  %s470_s10 = sshll.u32 %s575_s4, 4  ;;  %s471_s10 = int_to_ptr.vmem [resolvable:$true] %s470_s10 }
  0x12   :  { %393 = vperm.xlu0 %550, %v379_v13   ;;  %s552_s2 = scalar_lea.vmem %s471_s10, 16  ;;  %s556_s11 = scalar_lea.vmem %s471_s10, 32 }
  0x13   :  { %398 = vperm.xlu1 %551, %v380_v14   ;;  %521 = vmatmul.mubr.msk.f32.vlgmr.msra.gmra.mxu1 %vm178_vm1, %v174_v22  ;;  %p553_p0 = scmp.ne.s32.totalorder %s471_s10, %s552_s2  ;;  %p557_p1 = scmp.lt.s32.totalorder %s471_s10, %s471_s10 }
  0x14   :  { %523 = vmatprep.mubr.msk.f32.mxu1 %vm178_vm1, %v175_v23  ;;  %p558_p2 = scmp.lt.s32.totalorder %s556_s11, %s552_s2 }
  0x16   :  { %415 = vperm.xlu0 %550, %v409_v15   ;;  %p559_p3 = por %p558_p2, %p557_p1 }
  0x17   :  { %420 = vperm.xlu1 %551, %v410_v16   ;;  %524 = vmatmul.mubr.msk.f32.gmra.mxu1 %vm178_vm1, %v176_v24 }
  0x18   :  { %537 = vmatprep.mubr.msk.f32.mxu1 %vm279_vm2, %v171_v26  ;;  %p560_p4 = pnand %p559_p3, %p553_p0 }
  0x1a   :  { %425 = vperm.xlu0 %550, %v411_v17  }
  0x1b   :  { %430 = vperm.xlu1 %551, %v412_v18  }
  0x1e   :  { %454 = vperm.xlu0 %550, %v451_v19   ;;  %v457_v19 = vlaneseq }
  0x20   :  { %v458_v22 = vshrl.u32 %v457_v19, 7 }
  0x22   :  { %v459_v25 = vsub.s32 0, %v458_v22 }
  0x81   :  { %v62_v27 = vpop.permute.xlu0 %61 }
  0x82   :  { %v52_v29 = vpop.permute.xlu1 %51 }
  0x85   :  { %v57_v33 = vpop.permute.xlu0 %56 }
  0x86   :  { %v47_v38 = vpop.permute.xlu1 %46 }
  0x89   :  { %v384_v47 = vpop.permute.xlu0 %383 }
  0x8a   :  { %v389_v48 = vpop.permute.xlu1 %388 }
  0x8d   :  { %v394_v50 = vpop.permute.xlu0 %393 }
  0x8e   :  { %v399_v52 = vpop.permute.xlu1 %398 }
  0x91   :  { %v416_v55 = vpop.permute.xlu0 %415 }
  0x92   :  { %v421_v0 = vpop.permute.xlu1 %420 }
  0x95   :  { %v426_v8 = vpop.permute.xlu0 %425 }
  0x96   :  { %v431_v11 = vpop.permute.xlu1 %430 }
  0xc8   :  { %v514_v28 = vpop.f32.mrf.mxu0 }
  0xc9   :  { %v152_v35 = vadd.f32 %v514_v28, %v52_v29 }
  0xca   :  { %v146_v30 = vpop.f32.mrf.mxu0 }
  0xcb   :  { %v147_v39 = vadd.f32 %v146_v30, %v47_v38  ;;  %v166_v41 = vmax.f32 %v152_v35, 0.0 }
  0xcc   :  { %v517_v31 = vpop.f32.mrf.mxu0 }
  0xcd   :  { %v162_v32 = vadd.f32 %v517_v31, %v62_v27  ;;  %v165_v42 = vmax.f32 %v147_v39, 0.0  ;;  %v455_v27 = vpop.permute.xlu0 %454 }
  0xce   :  { %v156_v34 = vpop.f32.mrf.mxu0  ;;  %v460_v29 = vrot.slane %v455_v27, %v459_v25 }
  0xcf   :  { %v168_v36 = vmax.f32 %v162_v32, 0.0  ;;  %v157_v37 = vadd.f32 %v156_v34, %v57_v33 }
  0xd1   :  { %v167_v40 = vmax.f32 %v157_v37, 0.0  ;;  %526 = vmatprep.subr.mxu0 %v168_v36  ;;  %540 = vmatprep.subr.mxu1 %v168_v36 }
  0xd2   :  { %527 = vmatpush3.msra.mxu0 %v168_v36  ;;  %544 = vmatpush3.msra.mxu1 %v168_v36 }
  0xd3   :  { %528 = vmatprep.subr.mxu0 %v167_v40  ;;  %541 = vmatprep.subr.mxu1 %v167_v40  ;;  %v522_v45 = vpop.f32.mrf.mxu1 }
  0xd4   :  { %529 = vmatpush3.msra.mxu0 %v167_v40  ;;  %545 = vmatpush3.msra.mxu1 %v167_v40 }
  0xd5   :  { %530 = vmatprep.subr.mxu0 %v166_v41  ;;  %542 = vmatprep.subr.mxu1 %v166_v41  ;;  %v260_v46 = vpop.f32.mrf.mxu1 }
  0xd6   :  { %531 = vmatpush3.msra.mxu0 %v166_v41  ;;  %546 = vmatpush3.msra.mxu1 %v166_v41 }
  0xd7   :  { %532 = vmatprep.subr.mxu0 %v165_v42  ;;  %543 = vmatprep.subr.mxu1 %v165_v42  ;;  %v525_v49 = vpop.f32.mrf.mxu1 }
  0xd8   :  { %533 = vmatpush3.msra.mxu0 %v165_v42  ;;  %547 = vmatpush3.msra.mxu1 %v165_v42 }
  0xd9   :  { %535 = vmatmul.mubr.msk.f32.vlgmr.msra.gmra.mxu0 %vm279_vm2, %v170_v43  ;;  %538 = vmatmul.mubr.msk.f32.vlgmr.msra.gmra.mxu1 %vm279_vm2, %v172_v44  ;;  %v270_v51 = vpop.f32.mrf.mxu1 }
 0x199   :  { %v536_v53 = vpop.f32.mrf.mxu0  ;;  %v539_v54 = vpop.f32.mrf.mxu1 }
 0x19a   :  { %v364_v56 = vadd.f32 %v536_v53, %v522_v45  ;;  %v374_v57 = vadd.f32 %v539_v54, %v525_v49 }
 0x19b   :  { %v358_v58 = vpop.f32.mrf.mxu0  ;;  %v368_v59 = vpop.f32.mrf.mxu1 }
 0x19c   :  { %v402_v60 = vadd.f32 %v389_v48, %v364_v56  ;;  %v404_v61 = vadd.f32 %v399_v52, %v374_v57  ;;  %v359_v62 = vadd.f32 %v358_v58, %v260_v46  ;;  %v369_v63 = vadd.f32 %v368_v59, %v270_v51 }
 0x19e   :  { %v406_v1 = vmax.f32 %v402_v60, 0.0  ;;  %v401_v2 = vadd.f32 %v384_v47, %v359_v62  ;;  %v403_v3 = vadd.f32 %v394_v50, %v369_v63  ;;  %v408_v5 = vmax.f32 %v404_v61, 0.0 }
 0x1a0   :  { %v434_v4 = vmul.f32 %v421_v0, %v406_v1  ;;  %v405_v6 = vmax.f32 %v401_v2, 0.0  ;;  %v407_v7 = vmax.f32 %v403_v3, 0.0  ;;  %v436_v13 = vmul.f32 %v431_v11, %v408_v5 }
 0x1a2   :  { %v433_v9 = vmul.f32 %v416_v55, %v405_v6  ;;  %v435_v10 = vmul.f32 %v426_v8, %v407_v7  ;;  %v439_v12 = vsel %vm437_vm3, %v434_v4, 0.0  ;;  %v443_v18 = vsel %vm437_vm3, %v436_v13, 0.0 }
 0x1a4   :  { %v438_v14 = vsel %vm437_vm3, %v433_v9, 0.0  ;;  %v441_v16 = vsel %vm437_vm3, %v435_v10, 0.0 }
 0x1a5   :  { %v440_v15 = vadd.f32 %v439_v12, %v438_v14 }
 0x1a7   :  { %v442_v17 = vadd.f32 %v441_v16, %v440_v15 }
 0x1a9   :  { %v444_v20 = vadd.f32 %v443_v18, %v442_v17 }
 0x1ab   :  { %v445_v21 = vrot.slane %v444_v20, 4 }
 0x1ad   :  { %v446_v23 = vadd.f32 %v445_v21, %v444_v20 }
 0x1af   :  { %v447_v24 = vrot.slane %v446_v23, 2 }
 0x1b1   :  { %v448_v26 = vadd.f32 %v447_v24, %v446_v23 }
 0x1b3   :  { %v449_v28 = vrot.slane %v448_v26, 1 }
 0x1b5   :  { %v450_v30 = vadd.f32 %v449_v28, %v448_v26 }
 0x1b7   :  { %v461_v31 = vadd.f32 %v460_v29, %v450_v30 }
 0x1b9   :  { %463 = vst.msk [vmem:[#allocation3] sm:$0x1] %vm462_vm4, %v461_v31 }
 0x1ba   :  { %563 = shalt.err (!%p560_p4)
}
 0x1bb   :  { %473 = dma.vmem_to_hbm [thread:$0]  %s471_s10, 16, %s729_s9, [#allocation4]  }
 0x1bc   :  { %572 = dma.done.wait [#allocation4], 16  }
 0x1bd   :  { %573 = vsyncadd [#allocation4], 4294967280 }
 0x1be   :  { %477 = vsyncpa [#allocation4], 1 }

</bundles_post_ra>
